<compile_context>
chip_gen: v5e
topology: v5e:2x2
jax: 0.10.0
libtpu: 0.0.40
codegen_flags: <defaults>
</compile_context>

<pallas_src>
import jax
import jax.numpy as jnp
import jax.scipy.linalg as jsl
from jax.experimental import pallas as pl
from jax.experimental.pallas import tpu as pltpu

EPS = 1e-10
JITTER = 1e-06
PI = 3.1415

# Default f32 tile sizes.
ARD_TM = 512      # row (sublane) tile of the K-matrix writer
ARD_TN = 2048     # lane tile of the K-matrix writer (wide -> unmasked vst, big DMA)
PRED_TNT = 1024   # test-point (lane) axis tile
PRED_TNR = 1024   # training-point (reduction) axis tile

# 32 MiB scoped VMEM: raises the v5e 16 MiB default, matches v6e/v7x defaults, and is
# far above the ~8-16 MiB actually used by the double-buffered tiles below.
VMEM_LIMIT_BYTES = 32 * 1024 * 1024


# ---------------------------------------------------------------------------
# Pallas kernel 1: ARD / RBF kernel matrix  K(x1, x2) from augmented features.
#   x1_aug : (N1, D+2), x2_aug : (N2, D+2) such that
#   dot(x1_aug, x2_aug^T) == -0.5 * ||x1/l - x2/l||^2
# params (SMEM, f32[2]) = [signal_scale, diag_add]
# ---------------------------------------------------------------------------
def _make_ard_body(tm, tn, fuse_diag):
    def body(x1a_ref, x2a_ref, params_ref, k_ref):
        # (tm, D+2) x (tn, D+2) contracted on the feature axis -> (tm, tn) on the MXU.
        neg_half_d2 = jax.lax.dot_general(
            x1a_ref[...], x2a_ref[...], (((1,), (1,)), ((), ())),
            preferred_element_type=jnp.float32)
        k_ref[...] = params_ref[0] * jnp.exp(neg_half_d2)

        if fuse_diag:
            i = pl.program_id(0)
            j = pl.program_id(1)
            row0 = i * tm
            col0 = j * tn
            # tile touches the global diagonal iff its row/col ranges overlap
            touches_diag = jnp.logical_and(row0 < col0 + tn, col0 < row0 + tm)

            @pl.when(touches_diag)
            def _():
                rows = row0 + jax.lax.broadcasted_iota(jnp.int32, (tm, tn), 0)
                cols = col0 + jax.lax.broadcasted_iota(jnp.int32, (tm, tn), 1)
                k_ref[...] += jnp.where(rows == cols, params_ref[1], 0.0)
    return body


def ard_kernel(x1_aug, x2_aug, params, fuse_diag=False, tm=ARD_TM, tn=ARD_TN):
    n1, d2 = x1_aug.shape
    n2 = x2_aug.shape[0]
    tm = min(tm, n1)
    tn = min(tn, n2)
    grid = (pl.cdiv(n1, tm), pl.cdiv(n2, tn))
    return pl.pallas_call(
        _make_ard_body(tm, tn, fuse_diag),
        out_shape=jax.ShapeDtypeStruct((n1, n2), jnp.float32),
        grid=grid,
        in_specs=[
            pl.BlockSpec((tm, d2), lambda i, j: (i, 0)),
            pl.BlockSpec((tn, d2), lambda i, j: (j, 0)),
            pl.BlockSpec(memory_space=pltpu.MemorySpace.SMEM),
        ],
        out_specs=pl.BlockSpec((tm, tn), lambda i, j: (i, j)),
        compiler_params=pltpu.CompilerParams(
            dimension_semantics=("parallel", "parallel"),
            vmem_limit_bytes=VMEM_LIMIT_BYTES),
    )(x1_aug, x2_aug, params)


# ---------------------------------------------------------------------------
# Pallas kernel 2: GP prediction head (kx-free)
#   mean^T = beta^T @ LinvKx           (lane-dense (Q, Nt) output)
#   var    = kdiag - ones @ LinvKx^2 + noise   (lane-dense (1, Nt) output)
# consts (SMEM, f32[4]) = [Ystd, Ymean, noise_var, k_diag (= signal scale)]
# Grid = (Nt tiles [parallel], N reduction tiles [arbitrary]) with VMEM accumulators.
# The reduction axis is padded in the wrapper -> no in-kernel overhang masking.
# ---------------------------------------------------------------------------
def _make_predict_body():
    def body(beta_t_ref, linv_ref, consts_ref, mean_ref, var_ref, acc_ref, q_ref):
        k = pl.program_id(1)

        @pl.when(k == 0)
        def _():
            acc_ref[...] = jnp.zeros_like(acc_ref)
            q_ref[...] = jnp.zeros_like(q_ref)

        bt = beta_t_ref[...]          # (Q,   tnr)
        l = linv_ref[...]             # (tnr, tnt)

        # mean^T accumulation: (Q, tnr) @ (tnr, tnt) -> (Q, tnt) on the MXU.
        acc_ref[...] += jax.lax.dot_general(
            bt, l, (((1,), (0,)), ((), ())),
            preferred_element_type=jnp.float32)

        # variance reduction also on the MXU (no cross-sublane VPU/XLU reduce):
        # ones(1, tnr) @ (l*l) -> (1, tnt)
        ones_row = jnp.ones((1, l.shape[0]), jnp.float32)
        q_ref[...] += jax.lax.dot_general(
            ones_row, l * l, (((1,), (0,)), ((), ())),
            preferred_element_type=jnp.float32)

        @pl.when(k == pl.num_programs(1) - 1)
        def _():
            ystd = consts_ref[0]
            ymean = consts_ref[1]
            noise = consts_ref[2]
            kdiag = consts_ref[3]
            mean_ref[...] = acc_ref[...] * ystd + ymean
            var_ref[...] = (kdiag - q_ref[...] + noise) * (ystd * ystd)
    return body


def predict_head(beta_t, linvkx, consts, tnt=PRED_TNT, tnr=PRED_TNR):
    q, n = beta_t.shape
    n2, nt = linvkx.shape
    assert n == n2
    tnt = min(tnt, nt)
    tnr = min(tnr, n)

    # v7x megacore: the Nt-tile axis is the only 'parallel' axis; make sure it has
    # >= 2 blocks when Nt is large enough so both TensorCores get work.
    if nt >= 256 and pl.cdiv(nt, tnt) < 2:
        tnt = max(128, ((pl.cdiv(nt, 2) + 127) // 128) * 128)

    # Zero-pad the reduction axis to a multiple of tnr: padded rows/cols contribute
    # exactly zero, so the kernel needs no per-step overhang masking.
    n_pad = pl.cdiv(n, tnr) * tnr
    if n_pad != n:
        beta_t = jnp.pad(beta_t, ((0, 0), (0, n_pad - n)))
        linvkx = jnp.pad(linvkx, ((0, n_pad - n), (0, 0)))

    grid = (pl.cdiv(nt, tnt), n_pad // tnr)
    return pl.pallas_call(
        _make_predict_body(),
        out_shape=(jax.ShapeDtypeStruct((q, nt), jnp.float32),
                   jax.ShapeDtypeStruct((1, nt), jnp.float32)),
        grid=grid,
        in_specs=[
            pl.BlockSpec((q, tnr), lambda j, k: (0, k)),
            pl.BlockSpec((tnr, tnt), lambda j, k: (k, j)),
            pl.BlockSpec(memory_space=pltpu.MemorySpace.SMEM),
        ],
        out_specs=(pl.BlockSpec((q, tnt), lambda j, k: (0, j)),
                   pl.BlockSpec((1, tnt), lambda j, k: (0, j))),
        scratch_shapes=[pltpu.VMEM((q, tnt), jnp.float32),
                        pltpu.VMEM((1, tnt), jnp.float32)],
        compiler_params=pltpu.CompilerParams(
            dimension_semantics=("parallel", "arbitrary"),
            vmem_limit_bytes=VMEM_LIMIT_BYTES),
    )(beta_t, linvkx, consts)


# ---------------------------------------------------------------------------
# Feature augmentation for the distance-as-one-matmul trick.
#   slot=0: [x/l, -0.5*||x/l||^2, 1]       slot=1: [x/l, 1, -0.5*||x/l||^2]
# so dot(aug0, aug1^T) == -0.5 * squared euclidean distance of the scaled points.
# ---------------------------------------------------------------------------
def _augment(x, inv_ls_row, norm_slot):
    xs = x * inv_ls_row
    nrm = -0.5 * jnp.sum(xs * xs, axis=1, keepdims=True)
    ones = jnp.ones_like(nrm)
    if norm_slot == 0:
        return jnp.concatenate([xs, nrm, ones], axis=1).astype(jnp.float32)
    return jnp.concatenate([xs, ones, nrm], axis=1).astype(jnp.float32)


# ---------------------------------------------------------------------------
# CIGP module (JAX mirror of the PyTorch cigp class, normal_y_mode=0)
# ---------------------------------------------------------------------------
class CIGP:
    def __init__(self, X, Y, normal_y_mode=0):
        X = X.astype(jnp.float32)
        Y = Y.astype(jnp.float32)
        self.Xmean = X.mean(axis=0)
        self.Xstd = jnp.std(X, axis=0, ddof=1)          # torch .std() is unbiased
        self.X = (X - self.Xmean) / (self.Xstd + EPS)
        if normal_y_mode == 0:
            self.Ymean = Y.mean()
            self.Ystd = jnp.std(Y, ddof=1)
        else:
            self.Ymean = Y.mean(axis=0)
            self.Ystd = jnp.std(Y, axis=0, ddof=1)
        self.Y = (Y - self.Ymean) / (self.Ystd + EPS)

        # Deterministic parameter init mirroring __init__ / kernel.ARDKernel(1):
        self.log_beta = jnp.ones((1,), jnp.float32) * 10.0     # noise precision
        self.log_length_scale = jnp.zeros((1,), jnp.float32)   # one shared length scale
        self.log_scale = jnp.zeros((1,), jnp.float32)          # signal variance (log)

    def forward(self, Xte):
        Xte = Xte.astype(jnp.float32)
        # NOTE: the torch forward normalizes the test inputs WITHOUT the EPS term.
        Xte = (Xte - self.Xmean) / self.Xstd

        n, d = self.X.shape
        # reciprocal length scale precomputed once (multiply only, no divide)
        inv_ls_row = jnp.broadcast_to(
            jnp.exp(-self.log_length_scale), (d,)).reshape(1, d).astype(jnp.float32)
        kscale = jnp.exp(self.log_scale)[0]             # scalar signal variance
        noise = jnp.exp(-self.log_beta)[0]              # scalar noise variance

        # Augmented features so the Pallas kernel needs only a single MXU dot + exp.
        x_aug0 = _augment(self.X, inv_ls_row, 0)        # (N,  D+2)
        x_aug1 = _augment(self.X, inv_ls_row, 1)        # (N,  D+2)
        xte_aug1 = _augment(Xte, inv_ls_row, 1)         # (Nt, D+2)

        # Sigma = K(X, X) + (noise + JITTER) * I, diagonal add fused into the kernel
        # and gated to diagonal tiles only.
        params_train = jnp.stack([kscale, noise + jnp.float32(JITTER)]).astype(jnp.float32)
        Sigma = ard_kernel(x_aug0, x_aug1, params_train, fuse_diag=True)

        # Dense linear algebra in plain JAX
        L = jsl.cholesky(Sigma, lower=True)
        beta = jsl.solve_triangular(L, self.Y, lower=True)   # L^{-1} Y : (N, Q), tiny

        # K(X, Xte) via Pallas kernel (no diagonal add here)
        params_cross = jnp.stack([kscale, jnp.float32(0.0)]).astype(jnp.float32)
        kx = ard_kernel(x_aug0, xte_aug1, params_cross, fuse_diag=False)
        LinvKx = jsl.solve_triangular(L, kx, lower=True)

        # mean = kx^T Sigma^{-1} Y == LinvKx^T @ beta  -> the head streams ONLY LinvKx.
        # diag(K(Xte, Xte)) == kscale for every point (zero self-distance).
        consts = jnp.stack([self.Ystd.astype(jnp.float32),
                            self.Ymean.astype(jnp.float32),
                            noise.astype(jnp.float32),
                            kscale.astype(jnp.float32)])
        mean_t, var_row = predict_head(beta.T, LinvKx, consts)
        mean = mean_t.T                                          # (Nt, Q)
        var_diag = jnp.broadcast_to(var_row.T, mean.shape)       # (Nt, Q)
        return mean, var_diag


# ---------------------------------------------------------------------------
# Pure-JAX reference (sanity check of the Pallas path)
# ---------------------------------------------------------------------------
def _ref_forward(model, Xte):
    Xte = (Xte.astype(jnp.float32) - model.Xmean) / model.Xstd
    ls = jnp.exp(model.log_length_scale)
    sc = jnp.exp(model.log_scale)[0]
    noise = jnp.exp(-model.log_beta)[0]

    def k(a, b):
        a = a / ls
        b = b / ls
        d2 = (jnp.sum(a * a, 1)[:, None] - 2.0 * a @ b.T + jnp.sum(b * b, 1)[None, :])
        return sc * jnp.exp(-0.5 * d2)

    n = model.X.shape[0]
    Sigma = k(model.X, model.X) + (noise + JITTER) * jnp.eye(n, dtype=jnp.float32)
    L = jsl.cholesky(Sigma, lower=True)
    kx = k(model.X, Xte)
    LinvKx = jsl.solve_triangular(L, kx, lower=True)
    mean = kx.T @ jsl.cho_solve((L, True), model.Y)
    var = jnp.diag(k(Xte, Xte))[:, None] - jnp.sum(LinvKx ** 2, axis=0)[:, None] + noise
    mean = mean * model.Ystd + model.Ymean
    var = jnp.broadcast_to(var, mean.shape) * model.Ystd ** 2
    return mean, var


if __name__ == "__main__":
    key = jax.random.PRNGKey(0)
    k1, k2, k3 = jax.random.split(key, 3)

    N_TRAIN, N_TEST, D, Q = 32, 16, 4, 2
    X = jax.random.normal(k1, (N_TRAIN, D), dtype=jnp.float32)
    Y = jnp.concatenate(
        [jnp.sin(X.sum(axis=1, keepdims=True)),
         jnp.cos(X.sum(axis=1, keepdims=True))], axis=1) \
        + 0.05 * jax.random.normal(k2, (N_TRAIN, Q), dtype=jnp.float32)
    Xte = jax.random.normal(k3, (N_TEST, D), dtype=jnp.float32)

    model = CIGP(X, Y, normal_y_mode=0)
    mean, var = model.forward(Xte)
    mean = jax.block_until_ready(mean)
    var = jax.block_until_ready(var)

    ref_mean, ref_var = _ref_forward(model, Xte)
    assert mean.shape == (N_TEST, Q) and var.shape == (N_TEST, Q)
    assert jnp.allclose(mean, ref_mean, rtol=1e-4, atol=1e-4)
    assert jnp.allclose(var, ref_var, rtol=1e-4, atol=1e-4)

    print("KERNEL_OK")
</pallas_src>

<mosaic_0001>
module attributes {stable_mosaic.version = 11 : i64} {
  func.func @body(%arg0: i32, %arg1: i32, %arg2: memref<32x6xf32, #tpu.memory_space<vmem>>, %arg3: memref<32x6xf32, #tpu.memory_space<vmem>>, %arg4: memref<2xf32, #tpu.memory_space<smem>>, %arg5: memref<32x32xf32, #tpu.memory_space<vmem>>) attributes {dimension_semantics = [#tpu.dimension_semantics<parallel>, #tpu.dimension_semantics<parallel>], iteration_bounds = array<i64: 1, 1>, scalar_prefetch = 0 : i64, scratch_operands = 0 : i64, tpu.core_type = #tpu.core_type<tc>, window_params = [{transform_indices = @transform_0, window_bounds = array<i64: 32, 6>}, {transform_indices = @transform_1, window_bounds = array<i64: 32, 6>}, {transform_indices = @transform_2, window_bounds = array<i64: 2>}, {transform_indices = @transform_3, window_bounds = array<i64: 32, 32>}]} {
    %c0 = arith.constant 0 : index
    %c0_0 = arith.constant 0 : index
    %0 = vector.load %arg2[%c0, %c0_0] : memref<32x6xf32, #tpu.memory_space<vmem>>, vector<32x6xf32>
    %c0_1 = arith.constant 0 : index
    %c0_2 = arith.constant 0 : index
    %1 = vector.load %arg3[%c0_1, %c0_2] : memref<32x6xf32, #tpu.memory_space<vmem>>, vector<32x6xf32>
    %cst = arith.constant dense<0.000000e+00> : vector<32x32xf32>
    %2 = tpu.matmul %0, %1, %cst {dimension_numbers = #tpu.dot_dimension_numbers<[1], [1], [0], [0], [0, 0, 1, 0], [], []>} : vector<32x6xf32>, vector<32x6xf32>, vector<32x32xf32> -> vector<32x32xf32>
    %c0_3 = arith.constant 0 : index
    %3 = memref.load %arg4[%c0_3] : memref<2xf32, #tpu.memory_space<smem>>
    %4 = math.exp %2 : vector<32x32xf32>
    %5 = vector.broadcast %3 : f32 to vector<32x32xf32>
    %6 = arith.mulf %5, %4 : vector<32x32xf32>
    %c0_4 = arith.constant 0 : index
    %c0_5 = arith.constant 0 : index
    %7 = vector.load %arg5[%c0_4, %c0_5] : memref<32x32xf32, #tpu.memory_space<vmem>>, vector<32x32xf32>
    tpu.vector_store %arg5[%c0_4, %c0_5], %6 {strides = array<i32>} : memref<32x32xf32, #tpu.memory_space<vmem>>, vector<32x32xf32>,
    %c32_i32 = arith.constant 32 : i32
    %8 = arith.muli %arg0, %c32_i32 : i32
    %c32_i32_6 = arith.constant 32 : i32
    %9 = arith.muli %arg1, %c32_i32_6 : i32
    %c32_i32_7 = arith.constant 32 : i32
    %10 = arith.addi %9, %c32_i32_7 : i32
    %11 = arith.cmpi slt, %8, %10 : i32
    %c32_i32_8 = arith.constant 32 : i32
    %12 = arith.addi %8, %c32_i32_8 : i32
    %13 = arith.cmpi slt, %9, %12 : i32
    %14 = arith.andi %11, %13 : i1
    %15 = arith.extui %14 : i1 to i32
    %c0_i32 = arith.constant 0 : i32
    %16 = arith.cmpi ne, %15, %c0_i32 : i32
    scf.if %16 {
      %17 = tpu.iota {dimensions = array<i32: 0>} : vector<32x32xi32>
      %18 = vector.broadcast %8 : i32 to vector<32x32xi32>
      %19 = arith.addi %18, %17 : vector<32x32xi32>
      %20 = tpu.iota {dimensions = array<i32: 1>} : vector<32x32xi32>
      %21 = vector.broadcast %9 : i32 to vector<32x32xi32>
      %22 = arith.addi %21, %20 : vector<32x32xi32>
      %c0_9 = arith.constant 0 : index
      %c0_10 = arith.constant 0 : index
      %23 = vector.load %arg5[%c0_9, %c0_10] : memref<32x32xf32, #tpu.memory_space<vmem>>, vector<32x32xf32>
      %24 = arith.cmpi eq, %19, %22 : vector<32x32xi32>
      %c1 = arith.constant 1 : index
      %25 = memref.load %arg4[%c1] : memref<2xf32, #tpu.memory_space<smem>>
      %cst_11 = arith.constant 0.000000e+00 : f32
      %26 = vector.broadcast %25 : f32 to vector<32x32xf32>
      %27 = vector.broadcast %cst_11 : f32 to vector<32x32xf32>
      %28 = arith.select %24, %26, %27 : vector<32x32xi1>, vector<32x32xf32>
      %29 = arith.addf %23, %28 : vector<32x32xf32>
      %c0_12 = arith.constant 0 : index
      %c0_13 = arith.constant 0 : index
      %30 = vector.load %arg5[%c0_12, %c0_13] : memref<32x32xf32, #tpu.memory_space<vmem>>, vector<32x32xf32>
      tpu.vector_store %arg5[%c0_12, %c0_13], %29 {strides = array<i32>} : memref<32x32xf32, #tpu.memory_space<vmem>>, vector<32x32xf32>,
    } else {
    }
    return
  }
  func.func @transform_0(%arg0: i32, %arg1: i32) -> (i32, i32) {
    %c0_i32 = arith.constant 0 : i32
    %c0_i32_0 = arith.constant 0 : i32
    return %arg0, %c0_i32 : i32, i32
  }
  func.func @transform_1(%arg0: i32, %arg1: i32) -> (i32, i32) {
    %c0_i32 = arith.constant 0 : i32
    %c0_i32_0 = arith.constant 0 : i32
    return %arg1, %c0_i32 : i32, i32
  }
  func.func @transform_2(%arg0: i32, %arg1: i32) -> i32 {
    %c0_i32 = arith.constant 0 : i32
    %c0_i32_0 = arith.constant 0 : i32
    return %c0_i32 : i32
  }
  func.func @transform_3(%arg0: i32, %arg1: i32) -> (i32, i32) {
    %c0_i32 = arith.constant 0 : i32
    return %arg0, %arg1 : i32, i32
  }
}

</mosaic_0001>

<bundles_post_ra>
// kernel: tpu_custom_call.1
= control target key start
LH: loop header
LB: loop body
LE: loop exit
PB: predicated region body
PF: predicated region fallthrough
CT: control target
= control target key end

     0   :  { %8 = vsyncpa [#allocation4], 0  ;;  %s329_s0 = inlined_call_operand.vmem [shape: f32[32,6], index: 0, kind: input, shape index: {}]   ;;  %s330_s1 = inlined_call_operand.vmem [shape: f32[32,6], index: 1, kind: input, shape index: {}]   ;;  %s331_s2 = inlined_call_operand.vmem [shape: f32[2], index: 2, kind: input, shape index: {}]   ;;  %s332_s3 = inlined_call_operand.hbm [shape: f32[32,32], index: 3, kind: output, shape index: {}]  }
   0x1   :  { %9 = vsyncpa [#allocation3], 0  ;;  %s19_s14 = sshll.u32 %s331_s2, 4  ;;  %s247_s15 = smov [#allocation2]   ;;  %s20_s14 = int_to_ptr.vmem [resolvable:$true] %s19_s14 }
   0x2   :  { %22 = dma.vmem_to_smem %s20_s14, 16, %s247_s15, [#allocation4]  }
   0x3   :  { %243 = dma.done.wait [#allocation4], 16  }
   0x4   :  { %244 = vsyncadd [#allocation4], 4294967280 }
   0x5   :  { %27 = sfence }
   0x6   :  { %v35_v0 = vld [vmem:[%s330_s1 + $0x18] sm:$0xff]  ;;  %vm36_vm0 = vcmask 48128   ;;  %v34_v1 = vld [vmem:[%s330_s1 + $0x10] sm:$0xff]  ;;  %v33_v2 = vld [vmem:[%s330_s1 + $0x8] sm:$0xff]  ;;  %s90_s30 = sld [smem:[#allocation2]]  ;;  %v119_v12 = vlaneseq  ;;  %vm104_vm1 = vcmask 261120  }
   0x7   :  { %184 = vmatpush.xpose.msk.msra.mxu2 %vm36_vm0, %v35_v0  ;;  %185 = vmatpush.xpose.msk.msra.mxu3 %vm36_vm0, %v35_v0  ;;  %v32_v3 = vld [vmem:[%s330_s1] sm:$0xff]  ;;  %v30_v4 = vld [vmem:[%s329_s0 + $0x10] sm:$0xff]  ;;  %v31_v5 = vld [vmem:[%s329_s0 + $0x18] sm:$0xff]  ;;  %s182_s4 = sld [smem:[#allocation2 + $0x1]]  ;;  %s161_s8 = sshll.u32 %s332_s3, 4  ;;  %s162_s8 = int_to_ptr.hbm [resolvable:$true] %s161_s8 }
   0x8   :  { %174 = vmatpush.xpose.msk.msra.mxu0 %vm36_vm0, %v35_v0  ;;  %183 = vmatpush.xpose.msk.msra.mxu1 %vm36_vm0, %v35_v0  ;;  %v28_v6 = vld [vmem:[%s329_s0] sm:$0xff]  ;;  %v29_v7 = vld [vmem:[%s329_s0 + $0x8] sm:$0xff]  ;;  %v120_v18 = vshrl.u32 %v119_v12, 7  ;;  %v130_v22 = vand.u32 127, %v119_v12  ;;  %s248_s0 = smov [#allocation5]   ;;  %s249_s9 = smov 128  }
   0x9   :  { %s159_s5 = sshll.u32 %s248_s0, 4  ;;  %s250_s10 = smov 8   ;;  %s160_s5 = int_to_ptr.vmem [resolvable:$true] %s159_s5 }
   0xa   :  { %v121_v24 = vadd.s32 8, %v120_v18  ;;  %vm137_vm2 = vcmp.eq.s32.totalorder %v120_v18, %v130_v22  ;;  %v122_v29 = vadd.s32 16, %v120_v18  ;;  %v123_v31 = vadd.s32 24, %v120_v18 }
   0xb   :  { %187 = vmatpush.xpose.msk.msra.mxu2 %vm36_vm0, %v34_v1  ;;  %188 = vmatpush.xpose.msk.msra.mxu3 %vm36_vm0, %v34_v1 }
   0xc   :  { %175 = vmatpush.xpose.msk.msra.mxu0 %vm36_vm0, %v34_v1  ;;  %186 = vmatpush.xpose.msk.msra.mxu1 %vm36_vm0, %v34_v1  ;;  %v99_v17 = vstv %s90_s30  ;;  %vm138_vm3 = vcmp.eq.s32.totalorder %v121_v24, %v130_v22  ;;  %vm139_vm4 = vcmp.eq.s32.totalorder %v122_v29, %v130_v22  ;;  %vm140_vm5 = vcmp.eq.s32.totalorder %v123_v31, %v130_v22 }
   0xd   :  { %v142_v26 = vstv %s182_s4 }
   0xe   :  { %v143_v32 = vsel %vm137_vm2, %v142_v26, 0.0  ;;  %v144_v33 = vsel %vm138_vm3, %v142_v26, 0.0  ;;  %v145_v38 = vsel %vm139_vm4, %v142_v26, 0.0  ;;  %v146_v39 = vsel %vm140_vm5, %v142_v26, 0.0 }
   0xf   :  { %190 = vmatpush.xpose.msk.msra.mxu2 %vm36_vm0, %v33_v2  ;;  %191 = vmatpush.xpose.msk.msra.mxu3 %vm36_vm0, %v33_v2 }
  0x10   :  { %176 = vmatpush.xpose.msk.msra.mxu0 %vm36_vm0, %v33_v2  ;;  %189 = vmatpush.xpose.msk.msra.mxu1 %vm36_vm0, %v33_v2 }
  0x13   :  { %193 = vmatpush.xpose.msk.msra.mxu2 %vm36_vm0, %v32_v3  ;;  %194 = vmatpush.xpose.msk.msra.mxu3 %vm36_vm0, %v32_v3 }
  0x14   :  { %177 = vmatpush.xpose.msk.msra.mxu0 %vm36_vm0, %v32_v3  ;;  %192 = vmatpush.xpose.msk.msra.mxu1 %vm36_vm0, %v32_v3 }
  0x16   :  { %180 = vmatmul.msk.f32.vlgmr.msra.gmra.mxu2 %vm36_vm0, %v30_v4  ;;  %181 = vmatmul.msk.f32.vlgmr.msra.gmra.mxu3 %vm36_vm0, %v31_v5 }
  0x17   :  { %178 = vmatmul.msk.f32.vlgmr.msra.gmra.mxu0 %vm36_vm0, %v28_v6  ;;  %179 = vmatmul.msk.f32.vlgmr.msra.gmra.mxu1 %vm36_vm0, %v29_v7 }
  0x94   :  { %v78_v8 = vpop.f32.mrf.mxu0  ;;  %v81_v9 = vpop.f32.mrf.mxu1 }
  0x95   :  { %v91_v10 = vmul.f32 1.442695, %v78_v8  ;;  %v93_v11 = vmul.f32 1.442695, %v81_v9 }
  0x97   :  { %199 = vpow2.f32 %v91_v10 }
  0x98   :  { %201 = vpow2.f32 %v93_v11 }
  0x99   :  { %v84_v13 = vpop.f32.mrf.mxu2  ;;  %v87_v14 = vpop.f32.mrf.mxu3 }
  0x9a   :  { %v95_v15 = vmul.f32 1.442695, %v84_v13  ;;  %v97_v16 = vmul.f32 1.442695, %v87_v14 }
  0x9c   :  { %203 = vpow2.f32 %v95_v15 }
  0x9d   :  { %v200_v19 = vpop.eup %199  ;;  %205 = vpow2.f32 %v97_v16 }
  0x9e   :  { %v202_v20 = vpop.eup %201  ;;  %v100_v21 = vmul.f32 %v200_v19, %v99_v17 }
  0x9f   :  { %v101_v23 = vmul.f32 %v202_v20, %v99_v17 }
  0xa0   :  { %105 = vst.msk [vmem:[#allocation5] sm:$0xff] %vm104_vm1, %v100_v21 }
  0xa1   :  { %106 = vst.msk [vmem:[#allocation5 + $0x8] sm:$0xff] %vm104_vm1, %v101_v23 }
  0xa2   :  { %v204_v25 = vpop.eup %203 }
  0xa3   :  { %v206_v27 = vpop.eup %205  ;;  %v102_v28 = vmul.f32 %v204_v25, %v99_v17 }
  0xa4   :  { %v103_v30 = vmul.f32 %v206_v27, %v99_v17 }
  0xa5   :  { %107 = vst.msk [vmem:[#allocation5 + $0x10] sm:$0xff] %vm104_vm1, %v102_v28 }
  0xa6   :  { %108 = vst.msk [vmem:[#allocation5 + $0x18] sm:$0xff] %vm104_vm1, %v103_v30 }
  0xa7   :  { %v133_v34 = vld [vmem:[#allocation5] sm:$0xff] }
  0xa8   :  { %v147_v35 = vadd.f32 %v143_v32, %v133_v34  ;;  %v134_v36 = vld [vmem:[#allocation5 + $0x8] sm:$0xff] }
  0xa9   :  { %v148_v37 = vadd.f32 %v144_v33, %v134_v36 }
  0xaa   :  { %151 = vst.msk [vmem:[#allocation5] sm:$0xff] %vm104_vm1, %v147_v35 }
  0xab   :  { %152 = vst.msk [vmem:[#allocation5 + $0x8] sm:$0xff] %vm104_vm1, %v148_v37 }
  0xac   :  { %v135_v40 = vld [vmem:[#allocation5 + $0x10] sm:$0xff] }
  0xad   :  { %v149_v41 = vadd.f32 %v145_v38, %v135_v40  ;;  %v136_v42 = vld [vmem:[#allocation5 + $0x18] sm:$0xff] }
  0xae   :  { %v150_v43 = vadd.f32 %v146_v39, %v136_v42 }
  0xaf   :  { %153 = vst.msk [vmem:[#allocation5 + $0x10] sm:$0xff] %vm104_vm1, %v149_v41 }
  0xb0   :  { %154 = vst.msk [vmem:[#allocation5 + $0x18] sm:$0xff] %vm104_vm1, %v150_v43 }
  0xb1   :  { %167 = dma.vmem_to_hbm [thread:$0]  %s160_s5, 512, %s162_s8, [#allocation3], %s249_s9, %s249_s9, %s250_s10  }
  0xb2   :  { %245 = dma.done.wait [#allocation3], 512  }
  0xb3   :  { %246 = vsyncadd [#allocation3], 4294966784 }
  0xb4   :  { %172 = vsyncpa [#allocation3], 1 }
  0xb5   :  { %173 = vsyncpa [#allocation4], 1 }

</bundles_post_ra>
